<compile_context>
chip_gen: v7x
topology: tpu7x:2x2x1
jax: 0.10.0
libtpu: 0.0.40
codegen_flags: <defaults>
</compile_context>

<pallas_src>
import math
import functools
import jax
import jax.numpy as jnp
from jax.experimental import pallas as pl
from jax.experimental.pallas import tpu as pltpu


def _round_up(x, m):
    return (x + m - 1) // m * m


def _cdiv(a, b):
    return (a + b - 1) // b


# ----------------------------- Pallas kernel -------------------------------
def _transition_up_kernel(x_ref, w_ref, o_ref, xs_ref, *, starts, span, cin):
    # x_ref : (1, Cin, Lin)   bf16 flattened + zero-padded input (one batch elem)
    # w_ref : (M, G*Cin)      bf16 tap-folded weight, M = s*s*Cout
    # o_ref : (1, M, span)    f32 phase-major output on padded flat spatial grid
    # xs_ref: (G*Cin, span)   bf16 VMEM scratch: stacked shifted lane-windows
    #
    # Stack the G shifted windows once (unaligned lane shift paid once per tap),
    # then a single MXU matmul with K = G*Cin instead of G tiny K=Cin matmuls.
    for g, s0 in enumerate(starts):                 # G small & static -> unrolled
        xs_ref[g * cin:(g + 1) * cin, :] = x_ref[0, :, pl.ds(s0, span)]
    o_ref[0] = jnp.dot(w_ref[...], xs_ref[...],
                       preferred_element_type=jnp.float32).astype(o_ref.dtype)


# ------------------------------- wrapper ------------------------------------
def transition_up_forward(x_nchw, weight, *, stride, kernel_size, padding=1):
    """ConvTranspose2d(in,out,k,stride,padding, output_padding=0, bias=False).

    x_nchw : (B, Cin, H, W)
    weight : (Cin, Cout, k, k)   (PyTorch ConvTranspose2d weight layout)
    returns: (B, Cout, Hout, Wout), Hout = (H-1)*stride - 2*padding + k
    """
    B, Cin, H, W = x_nchw.shape
    Cout = weight.shape[1]
    k, s = kernel_size, stride
    conv_pad = k - 1 - padding
    assert conv_pad >= 0, "requires padding <= kernel_size - 1 (output_padding == 0)"
    Hout = (H - 1) * s - 2 * padding + k
    Wout = (W - 1) * s - 2 * padding + k
    assert Hout % s == 0 and Wout % s == 0, \
        "sub-pixel decomposition needs (kernel_size - 2*padding) % stride == 0"
    Hph, Wph = Hout // s, Wout // s

    # ---- per-phase tap table: phase residue r -> list of (shift d, tap index p)
    def phase_taps(r):
        p0 = (conv_pad - r) % s
        shift = (r + p0 - conv_pad) // s           # always an integer
        taps, a = [], 0
        while p0 + s * a < k:
            taps.append((a + shift, p0 + s * a))
            a += 1
        return taps

    taps_y = [phase_taps(ry) for ry in range(s)]
    taps_x = [phase_taps(rx) for rx in range(s)]
    dys = sorted({d for t in taps_y for (d, _) in t})
    dxs = sorted({d for t in taps_x for (d, _) in t})
    halo_t, halo_l = max(0, -dys[0]), max(0, -dxs[0])
    Hp = halo_t + max(H, Hph + dys[-1])
    Wp = halo_l + max(W, Wph + dxs[-1])

    offsets = sorted({dy * Wp + dx
                      for ty in taps_y for (dy, _) in ty
                      for tx in taps_x for (dx, _) in tx})
    G = len(offsets)
    M = s * s * Cout
    span = _round_up(Hp * Wp, 128)                  # lane-dense output span

    # ---- ONE host-side pad: lead rows absorb the most negative flat offset,
    # trailing rows absorb the most positive offset + span alignment.
    lead_rows = _cdiv(max(0, -offsets[0]), Wp)
    base = lead_rows * Wp
    total_rows = max(lead_rows + Hp, _cdiv(base + offsets[-1] + span, Wp))
    Lin = total_rows * Wp
    pad_top = lead_rows + halo_t
    pad_bot = total_rows - lead_rows - halo_t - H
    pad_left = halo_l
    pad_right = Wp - halo_l - W
    x_in = jnp.pad(x_nchw.astype(jnp.bfloat16),
                   ((0, 0), (0, 0), (pad_top, pad_bot), (pad_left, pad_right))
                   ).reshape(B, Cin, Lin)
    starts = tuple(int(base + o) for o in offsets)

    # ---- tap-folded weight (M, G*Cin), bf16; single stack/transpose/reshape.
    # w_flip[p, q, ci, co] = weight[ci, co, k-1-p, k-1-q]
    w_flip = jnp.transpose(weight[:, :, ::-1, ::-1], (2, 3, 0, 1)).astype(jnp.float32)
    zero_blk = jnp.zeros((Cout, Cin), jnp.float32)
    g_blocks = []
    for off in offsets:
        p_blocks = []
        for ry in range(s):
            for rx in range(s):
                blk = zero_blk
                for (dy, p) in taps_y[ry]:
                    for (dx, q) in taps_x[rx]:
                        if dy * Wp + dx == off:
                            blk = blk + w_flip[p, q].T        # (Cout, Cin)
                p_blocks.append(blk)
        g_blocks.append(jnp.stack(p_blocks, axis=0))          # (s*s, Cout, Cin)
    w_stack = jnp.stack(g_blocks, axis=0)                     # (G, s*s, Cout, Cin)
    w_flat = jnp.transpose(w_stack, (1, 2, 0, 3)).reshape(M, G * Cin)
    w_flat = w_flat.astype(jnp.bfloat16)

    # ---- VMEM budget from the actual block sizes (double-buffered in/out) ----
    blk_bytes = (2 * Cin * Lin * 2 + 2 * M * G * Cin * 2
                 + 2 * M * span * 4 + G * Cin * span * 2)
    vmem_limit = int(max(4 * 1024 * 1024, 4 * blk_bytes))
    cost = pl.CostEstimate(
        flops=int(2 * B * M * G * Cin * span),
        transcendentals=0,
        bytes_accessed=int(B * Cin * Lin * 2 + M * G * Cin * 2 + B * M * span * 4))

    kernel = functools.partial(_transition_up_kernel,
                               starts=starts, span=span, cin=Cin)
    out = pl.pallas_call(
        kernel,
        out_shape=jax.ShapeDtypeStruct((B, M, span), jnp.float32),
        grid=(B,),
        in_specs=[
            pl.BlockSpec((1, Cin, Lin), lambda b: (b, 0, 0)),
            pl.BlockSpec((M, G * Cin), lambda b: (0, 0)),
        ],
        out_specs=pl.BlockSpec((1, M, span), lambda b: (b, 0, 0)),
        scratch_shapes=[pltpu.VMEM((G * Cin, span), jnp.bfloat16)],
        compiler_params=pltpu.CompilerParams(
            dimension_semantics=("parallel",),
            vmem_limit_bytes=vmem_limit),
        cost_estimate=cost,
    )(x_in, w_flat)

    # ---- crop halo + depth-to-space (phase interleave) ----
    # TODO(synk): at production sizes fuse this crop/interleave into the consumer
    # (or keep phase-major output) instead of paying a separate HBM transpose pass.
    raw = out[:, :, :Hp * Wp].reshape(B, s, s, Cout, Hp, Wp)
    valid = raw[:, :, :, :, halo_t:halo_t + Hph, halo_l:halo_l + Wph]
    y = valid.transpose(0, 3, 4, 1, 5, 2).reshape(B, Cout, Hout, Wout)
    return y


# ------------------------- parameter construction ---------------------------
def xavier_uniform_convT(key, cin, cout, k, gain=1.0):
    # PyTorch fan calc for (Cin, Cout, k, k): fan_in = Cout*k*k, fan_out = Cin*k*k
    fan_in, fan_out = cout * k * k, cin * k * k
    bound = gain * math.sqrt(6.0 / (fan_in + fan_out))
    return jax.random.uniform(key, (cin, cout, k, k), jnp.float32, -bound, bound)


def _l2normalize(v, eps=1e-12):
    return v / (jnp.linalg.norm(v) + eps)


def spectral_norm_weight(w, key, power_iterations=1):
    # Functional version of SpectralNorm(module): view weight as (shape[0], -1),
    # power-iterate u/v, divide by sigma.
    # NOTE: PyTorch's SpectralNorm persists `u` across calls; here a fresh u is
    # drawn per call (single power iteration), so sigma matches only in expectation.
    height = w.shape[0]
    w_mat = w.reshape(height, -1)
    ku, kv = jax.random.split(key)
    u = _l2normalize(jax.random.normal(ku, (height,), jnp.float32))
    _ = _l2normalize(jax.random.normal(kv, (w_mat.shape[1],), jnp.float32))
    for _i in range(power_iterations):
        v = _l2normalize(w_mat.T @ u)
        u = _l2normalize(w_mat @ v)
    sigma = u @ (w_mat @ v)
    return w / sigma


# ---------------------------------- main -------------------------------------
if __name__ == "__main__":
    key = jax.random.PRNGKey(0)
    k_x, k_w, k_u = jax.random.split(key, 3)

    # TransitionUp(in_channels=4, out_channels=4, stride=2, kernel_size=4)
    B, Cin, Cout, H, W = 2, 4, 4, 16, 16
    kernel_size, stride, padding = 4, 2, 1

    x = jax.random.normal(k_x, (B, Cin, H, W), jnp.float32)
    w_raw = xavier_uniform_convT(k_w, Cin, Cout, kernel_size, gain=1.0)
    w_sn = spectral_norm_weight(w_raw, k_u, power_iterations=1)

    out = transition_up_forward(x, w_sn, stride=stride,
                                kernel_size=kernel_size, padding=padding)
    out = jax.block_until_ready(out)

    # sanity-check against a pure-JAX transposed conv on the same bf16-rounded
    # operands (kernel streams bf16, accumulates f32).
    x_bf = x.astype(jnp.bfloat16).astype(jnp.float32)
    w_bf = w_sn.astype(jnp.bfloat16).astype(jnp.float32)
    w_oihw = jnp.transpose(w_bf[:, :, ::-1, ::-1], (1, 0, 2, 3))
    conv_pad = kernel_size - 1 - padding
    ref = jax.lax.conv_general_dilated(
        x_bf, w_oihw, window_strides=(1, 1),
        padding=[(conv_pad, conv_pad), (conv_pad, conv_pad)],
        lhs_dilation=(stride, stride),
        dimension_numbers=("NCHW", "OIHW", "NCHW"),
        precision=jax.lax.Precision.HIGHEST)
    Hout = (H - 1) * stride - 2 * padding + kernel_size
    assert out.shape == (B, Cout, Hout, Hout), out.shape
    assert jnp.allclose(out, ref, atol=2e-3, rtol=2e-3)

    print("KERNEL_OK")
</pallas_src>

<mosaic_0001>
module attributes {stable_mosaic.version = 11 : i64} {
  func.func @_transition_up_kernel(%arg0: i32, %arg1: memref<1x4x450xbf16, #tpu.memory_space<vmem>>, %arg2: memref<16x36xbf16, #tpu.memory_space<vmem>>, %arg3: memref<1x16x384xf32, #tpu.memory_space<vmem>>, %arg4: memref<36x384xbf16, #tpu.memory_space<vmem>>) attributes {dimension_semantics = [#tpu.dimension_semantics<parallel>], iteration_bounds = array<i64: 2>, scalar_prefetch = 0 : i64, scratch_operands = 1 : i64, tpu.core_type = #tpu.core_type<tc>, window_params = [{transform_indices = @transform_0, window_bounds = array<i64: 1, 4, 450>}, {pipeline_mode = #tpu.pipeline_mode<synchronous>, transform_indices = @transform_1, window_bounds = array<i64: 16, 36>}, {transform_indices = @transform_2, window_bounds = array<i64: 1, 16, 384>}]} {
    %c0 = arith.constant 0 : index
    %c0_0 = arith.constant 0 : index
    %c17 = arith.constant 17 : index
    %0 = vector.load %arg1[%c0, %c0_0, %c17] : memref<1x4x450xbf16, #tpu.memory_space<vmem>>, vector<1x4x384xbf16>
    %1 = vector.shape_cast %0 : vector<1x4x384xbf16> to vector<4x384xbf16>
    %c0_1 = arith.constant 0 : index
    %c0_2 = arith.constant 0 : index
    %2 = vector.load %arg4[%c0_1, %c0_2] : memref<36x384xbf16, #tpu.memory_space<vmem>>, vector<4x384xbf16>
    tpu.vector_store %arg4[%c0_1, %c0_2], %1 {strides = array<i32>} : memref<36x384xbf16, #tpu.memory_space<vmem>>, vector<4x384xbf16>,
    %c0_3 = arith.constant 0 : index
    %c0_4 = arith.constant 0 : index
    %c18 = arith.constant 18 : index
    %3 = vector.load %arg1[%c0_3, %c0_4, %c18] : memref<1x4x450xbf16, #tpu.memory_space<vmem>>, vector<1x4x384xbf16>
    %4 = vector.shape_cast %3 : vector<1x4x384xbf16> to vector<4x384xbf16>
    %c4 = arith.constant 4 : index
    %c0_5 = arith.constant 0 : index
    %5 = vector.load %arg4[%c4, %c0_5] : memref<36x384xbf16, #tpu.memory_space<vmem>>, vector<4x384xbf16>
    tpu.vector_store %arg4[%c4, %c0_5], %4 {strides = array<i32>} : memref<36x384xbf16, #tpu.memory_space<vmem>>, vector<4x384xbf16>,
    %c0_6 = arith.constant 0 : index
    %c0_7 = arith.constant 0 : index
    %c19 = arith.constant 19 : index
    %6 = vector.load %arg1[%c0_6, %c0_7, %c19] : memref<1x4x450xbf16, #tpu.memory_space<vmem>>, vector<1x4x384xbf16>
    %7 = vector.shape_cast %6 : vector<1x4x384xbf16> to vector<4x384xbf16>
    %c8 = arith.constant 8 : index
    %c0_8 = arith.constant 0 : index
    %8 = vector.load %arg4[%c8, %c0_8] : memref<36x384xbf16, #tpu.memory_space<vmem>>, vector<4x384xbf16>
    tpu.vector_store %arg4[%c8, %c0_8], %7 {strides = array<i32>} : memref<36x384xbf16, #tpu.memory_space<vmem>>, vector<4x384xbf16>,
    %c0_9 = arith.constant 0 : index
    %c0_10 = arith.constant 0 : index
    %c35 = arith.constant 35 : index
    %9 = vector.load %arg1[%c0_9, %c0_10, %c35] : memref<1x4x450xbf16, #tpu.memory_space<vmem>>, vector<1x4x384xbf16>
    %10 = vector.shape_cast %9 : vector<1x4x384xbf16> to vector<4x384xbf16>
    %c12 = arith.constant 12 : index
    %c0_11 = arith.constant 0 : index
    %11 = vector.load %arg4[%c12, %c0_11] : memref<36x384xbf16, #tpu.memory_space<vmem>>, vector<4x384xbf16>
    tpu.vector_store %arg4[%c12, %c0_11], %10 {strides = array<i32>} : memref<36x384xbf16, #tpu.memory_space<vmem>>, vector<4x384xbf16>,
    %c0_12 = arith.constant 0 : index
    %c0_13 = arith.constant 0 : index
    %c36 = arith.constant 36 : index
    %12 = vector.load %arg1[%c0_12, %c0_13, %c36] : memref<1x4x450xbf16, #tpu.memory_space<vmem>>, vector<1x4x384xbf16>
    %13 = vector.shape_cast %12 : vector<1x4x384xbf16> to vector<4x384xbf16>
    %c16 = arith.constant 16 : index
    %c0_14 = arith.constant 0 : index
    %14 = vector.load %arg4[%c16, %c0_14] : memref<36x384xbf16, #tpu.memory_space<vmem>>, vector<4x384xbf16>
    tpu.vector_store %arg4[%c16, %c0_14], %13 {strides = array<i32>} : memref<36x384xbf16, #tpu.memory_space<vmem>>, vector<4x384xbf16>,
    %c0_15 = arith.constant 0 : index
    %c0_16 = arith.constant 0 : index
    %c37 = arith.constant 37 : index
    %15 = vector.load %arg1[%c0_15, %c0_16, %c37] : memref<1x4x450xbf16, #tpu.memory_space<vmem>>, vector<1x4x384xbf16>
    %16 = vector.shape_cast %15 : vector<1x4x384xbf16> to vector<4x384xbf16>
    %c20 = arith.constant 20 : index
    %c0_17 = arith.constant 0 : index
    %17 = vector.load %arg4[%c20, %c0_17] : memref<36x384xbf16, #tpu.memory_space<vmem>>, vector<4x384xbf16>
    tpu.vector_store %arg4[%c20, %c0_17], %16 {strides = array<i32>} : memref<36x384xbf16, #tpu.memory_space<vmem>>, vector<4x384xbf16>,
    %c0_18 = arith.constant 0 : index
    %c0_19 = arith.constant 0 : index
    %c53 = arith.constant 53 : index
    %18 = vector.load %arg1[%c0_18, %c0_19, %c53] : memref<1x4x450xbf16, #tpu.memory_space<vmem>>, vector<1x4x384xbf16>
    %19 = vector.shape_cast %18 : vector<1x4x384xbf16> to vector<4x384xbf16>
    %c24 = arith.constant 24 : index
    %c0_20 = arith.constant 0 : index
    %20 = vector.load %arg4[%c24, %c0_20] : memref<36x384xbf16, #tpu.memory_space<vmem>>, vector<4x384xbf16>
    tpu.vector_store %arg4[%c24, %c0_20], %19 {strides = array<i32>} : memref<36x384xbf16, #tpu.memory_space<vmem>>, vector<4x384xbf16>,
    %c0_21 = arith.constant 0 : index
    %c0_22 = arith.constant 0 : index
    %c54 = arith.constant 54 : index
    %21 = vector.load %arg1[%c0_21, %c0_22, %c54] : memref<1x4x450xbf16, #tpu.memory_space<vmem>>, vector<1x4x384xbf16>
    %22 = vector.shape_cast %21 : vector<1x4x384xbf16> to vector<4x384xbf16>
    %c28 = arith.constant 28 : index
    %c0_23 = arith.constant 0 : index
    %23 = vector.load %arg4[%c28, %c0_23] : memref<36x384xbf16, #tpu.memory_space<vmem>>, vector<4x384xbf16>
    tpu.vector_store %arg4[%c28, %c0_23], %22 {strides = array<i32>} : memref<36x384xbf16, #tpu.memory_space<vmem>>, vector<4x384xbf16>,
    %c0_24 = arith.constant 0 : index
    %c0_25 = arith.constant 0 : index
    %c55 = arith.constant 55 : index
    %24 = vector.load %arg1[%c0_24, %c0_25, %c55] : memref<1x4x450xbf16, #tpu.memory_space<vmem>>, vector<1x4x384xbf16>
    %25 = vector.shape_cast %24 : vector<1x4x384xbf16> to vector<4x384xbf16>
    %c32 = arith.constant 32 : index
    %c0_26 = arith.constant 0 : index
    %26 = vector.load %arg4[%c32, %c0_26] : memref<36x384xbf16, #tpu.memory_space<vmem>>, vector<4x384xbf16>
    tpu.vector_store %arg4[%c32, %c0_26], %25 {strides = array<i32>} : memref<36x384xbf16, #tpu.memory_space<vmem>>, vector<4x384xbf16>,
    %c0_27 = arith.constant 0 : index
    %c0_28 = arith.constant 0 : index
    %27 = vector.load %arg2[%c0_27, %c0_28] : memref<16x36xbf16, #tpu.memory_space<vmem>>, vector<16x36xbf16>
    %c0_29 = arith.constant 0 : index
    %c0_30 = arith.constant 0 : index
    %28 = vector.load %arg4[%c0_29, %c0_30] : memref<36x384xbf16, #tpu.memory_space<vmem>>, vector<36x384xbf16>
    %cst = arith.constant dense<0.000000e+00> : vector<16x384xf32>
    %29 = tpu.matmul %27, %28, %cst {dimension_numbers = #tpu.dot_dimension_numbers<[1], [0], [0], [1], [0, 0, 1, 1], [], []>} : vector<16x36xbf16>, vector<36x384xbf16>, vector<16x384xf32> -> vector<16x384xf32>
    %c0_31 = arith.constant 0 : index
    %c0_32 = arith.constant 0 : index
    %c0_33 = arith.constant 0 : index
    %30 = vector.load %arg3[%c0_31, %c0_32, %c0_33] : memref<1x16x384xf32, #tpu.memory_space<vmem>>, vector<1x16x384xf32>
    %31 = vector.shape_cast %30 : vector<1x16x384xf32> to vector<16x384xf32>
    %32 = vector.shape_cast %29 : vector<16x384xf32> to vector<1x16x384xf32>
    tpu.vector_store %arg3[%c0_31, %c0_32, %c0_33], %32 {strides = array<i32>} : memref<1x16x384xf32, #tpu.memory_space<vmem>>, vector<1x16x384xf32>,
    return
  }
  func.func @transform_0(%arg0: i32) -> (i32, i32, i32) {
    %c0_i32 = arith.constant 0 : i32
    %c0_i32_0 = arith.constant 0 : i32
    %c0_i32_1 = arith.constant 0 : i32
    return %arg0, %c0_i32, %c0_i32_0 : i32, i32, i32
  }
  func.func @transform_1(%arg0: i32) -> (i32, i32) {
    %c0_i32 = arith.constant 0 : i32
    %c0_i32_0 = arith.constant 0 : i32
    %c0_i32_1 = arith.constant 0 : i32
    return %c0_i32, %c0_i32_0 : i32, i32
  }
  func.func @transform_2(%arg0: i32) -> (i32, i32, i32) {
    %c0_i32 = arith.constant 0 : i32
    %c0_i32_0 = arith.constant 0 : i32
    %c0_i32_1 = arith.constant 0 : i32
    return %arg0, %c0_i32, %c0_i32_0 : i32, i32, i32
  }
}

</mosaic_0001>

<bundles_post_ra>
// kernel: tpu_custom_call.1
= control target key start
LH: loop header
LB: loop body
LE: loop exit
PB: predicated region body
PF: predicated region fallthrough
CT: control target
= control target key end

     0   :  { %7 = vsyncpa [#allocation4], 0  ;;  %s1226_s0 = inlined_call_operand.hbm [shape: bf16[2,4,450], index: 0, kind: input, shape index: {}]   ;;  %s1227_s1 = inlined_call_operand.hbm [shape: bf16[16,36], index: 1, kind: input, shape index: {}]   ;;  %s1228_s2 = inlined_call_operand.hbm [shape: f32[2,16,384], index: 2, kind: output, shape index: {}]  }
   0x1   :  { %9 = vsyncpa [#allocation4 + $0x1], 0 }
   0x2   :  { %10 = vsyncpa [#allocation7], 0 }
   0x3   :  { %11 = vsyncpa [#allocation5], 0 }
   0x4   :  { %13 = vsyncpa [#allocation5 + $0x1], 0  ;;  %s1010_s9 = smov 0   ;;  %s1012_s10 = smov 0  }
   0x5   :  { %s1014_s11 = smov 0   ;;  %s1016_s12 = smov 0  }
   0x6 LB: > { %s1031_s13 = sadd.s32 4294967295, %s973_s12   ;;  %s714_s14 = sadd.s32 4294967294, %s973_s12   ;;  %s973_s12 = sphi %s1016_s12, %s1248_s12   ;;  %s969_s11 = sphi %s1014_s11, %s1247_s11   ;;  %s965_s10 = sphi %s1012_s10, %s1246_s10   ;;  %s961_s9 = sphi %s1010_s9, %s1245_s9  }
   0x7   : > { %p39_p0 = scmp.ne.s32.totalorder %s965_s10, %s961_s9  ;;  %p1229_p1 = scmp.eq.s32.totalorder %s1031_s13, 0 }
   0x8   : > { %p90_p3 = scmp.eq.s32.totalorder %s714_s14, 1  ;;  %p715_p5 = scmp.ge.s32.totalorder %s973_s12, 1 }
   0x9   : > { %p1040_p4 = por %p1229_p1, %p39_p0  ;;  %p97_p7 = scmp.lt.s32.totalorder %s973_s12, 3 }
   0xa   : > { %p1045_p6 = por %p90_p3, %p39_p0  ;;  %s975_s18 = smov [#allocation6]  }
   0xb   : > { %s1232_s15 = scalar_select %p1040_p4, 1, 0 }
   0xc   : > { %s1233_s16 = scalar_select %p1045_p6, 1, 0 }
   0xd   : > { %p1050_p8 = pnand %p715_p5, %p97_p7  ;;  %s109_s19 = sshll.u32 %s975_s18, 4  ;;  %s1054_s19 = int_to_ptr.vmem [resolvable:$true] %s109_s19 }
   0xe   : > { %s1066_s21 = sadd.s32 1, %s973_s12   ;;  %s26_s22 = sadd.s32 1, %s969_s11 }
   0xf   : > { %s1234_s17 = scalar_select %p1050_p8, 1, 0 }
  0x10   : > { %p765_p9 = pneg %p1050_p8  ;;  %s23_s23 = ssub.s32 %s973_s12, %s1066_s21 }
  0x11   : > { %s845_s26 = scalar_lea.hbm %s1227_s1, 128 }
  0x12   : > { %p1061_p11 = pnand %p765_p9, %p1229_p1  ;;  %p846_p12 = scmp.ne.s32.totalorder %s1227_s1, %s845_s26 }
  0x13   : > { %p852_p5 = scmp.lt.u32.totalorder %s845_s26, %s1227_s1 }
  0x14   : > { %p847_p13 = pneg %p1061_p11 }
  0x16   : > { %p848_p0 = pnand %p847_p13, %p846_p12 }
  0x18   : > { %p849_p3 = pneg %p848_p0 }
  0x1a   : > { %p854_p7 = pnand %p852_p5, %p849_p3 }
  0x1c   : > { %857 = shalt.err (!%p854_p7)
}
  0x1d   : > { %s858_s3 = scalar_lea.vmem %s1054_s19, 128  ;;  %p866_p2 = scmp.lt.s32.totalorder %s1054_s19, %s1054_s19 }
  0x1e   : > { %p859_p9 = scmp.ne.s32.totalorder %s1054_s19, %s858_s3  ;;  %p867_p6 = scmp.lt.s32.totalorder %s858_s3, %s858_s3 }
  0x20   : > { %p861_p10 = pnand %p859_p9, %p847_p13  ;;  %p868_p4 = por %p867_p6, %p866_p2 }
  0x22   : > { %p862_p1 = pneg %p861_p10 }
  0x24   : > { %p869_p8 = pnand %p868_p4, %p862_p1 }
  0x26   : > { %872 = shalt.err (!%p869_p8)
}
  0x27   : > { %s976_s4 = smov 64   ;;  %s977_s5 = smov 4  }
  0x28   : > { %768 = dma.hbm_to_vmem [thread:$0]  (!%p1061_p11), %s1227_s1, 128, %s1054_s19, [#allocation7], %s976_s4, %s976_s4, %s977_s5  }
  0x29   : > { %p24_p2 = scmp.eq.s32.totalorder %s23_s23, 0  ;;  %p33_p1 = scmp.ne.s32.totalorder %s969_s11, %s965_s10 }
  0x2a   : > { %p34_p4 = scmp.eq.s32.totalorder %s973_s12, 0  ;;  %p778_p6 = scmp.lt.s32.totalorder %s973_s12, 2 }
  0x2b   : > { %s1097_s8 = scalar_select %p24_p2, %s969_s11, %s26_s22  }
  0x2c   : > { %p35_p8 = por %p34_p4, %p33_p1  ;;  %p1236_p10 = scmp.eq.s32.totalorder %s1031_s13, 1 }
  0x2d   : > { %s123_s18 = sand.u32 1, %s969_s11   ;;  %s740_s24 = sshll.u32 %s973_s12, 7 }
  0x2e   : > { %p1101_p12 = por %p1236_p10, %p33_p1  ;;  %s718_s25 = sshll.u32 %s123_s18, 3 }
  0x2f   : > { %s1110_s27 = scalar_lea.hbm %s1226_s0, %s740_s24  ;;  %s127_s19 = scalar_lea.vmem [#allocation3], %s718_s25 }
  0x30   : > { %s135_s22 = sshll.u32 %s127_s19, 4  ;;  %p1112_p11 = pnand %p778_p6, %p35_p8  ;;  %s1116_s22 = int_to_ptr.vmem [resolvable:$true] %s135_s22 }
  0x31   : > { %s124_s28 = scalar_lea.sflag [#allocation4], %s123_s18  ;;  %s873_s29 = scalar_lea.hbm %s1110_s27, 128 }
  0x32   : > { %p874_p13 = scmp.ne.s32.totalorder %s1110_s27, %s873_s29  ;;  %p875_p0 = pneg %p1112_p11 }
  0x33   : > { %s878_s4 = scalar_lea.hbm %s1226_s0, 256  ;;  %p879_p7 = scmp.lt.u32.totalorder %s1110_s27, %s1226_s0 }
  0x34   : > { %p876_p3 = pnand %p875_p0, %p874_p13  ;;  %p880_p9 = scmp.lt.u32.totalorder %s878_s4, %s873_s29 }
  0x35   : > { %p882_p1 = scmp.lt.u32.totalorder %s873_s29, %s1110_s27 }
  0x36   : > { %p877_p5 = pneg %p876_p3  ;;  %p881_p2 = por %p880_p9, %p879_p7 }
  0x38   : > { %p883_p4 = por %p882_p1, %p881_p2 }
  0x3a   : > { %p884_p6 = pnand %p883_p4, %p877_p5 }
  0x3c   : > { %887 = shalt.err (!%p884_p6)
}
  0x3d   : > { %s888_s7 = scalar_lea.vmem %s1116_s22, 128  ;;  %s978_s18 = smov [#allocation3]  }
  0x3e   : > { %p889_p8 = scmp.ne.s32.totalorder %s1116_s22, %s888_s7  ;;  %s893_s24 = sshll.u32 %s978_s18, 4  ;;  %s894_s24 = int_to_ptr.vmem [resolvable:$false] %s893_s24 }
  0x3f   : > { %s895_s25 = scalar_lea.vmem %s894_s24, 256  ;;  %p896_p3 = scmp.lt.s32.totalorder %s1116_s22, %s894_s24 }
  0x40   : > { %p891_p10 = pnand %p889_p8, %p875_p0  ;;  %p897_p7 = scmp.lt.s32.totalorder %s895_s25, %s888_s7 }
  0x42   : > { %p892_p13 = pneg %p891_p10  ;;  %p898_p9 = por %p897_p7, %p896_p3 }
  0x44   : > { %p899_p2 = pnand %p898_p9, %p892_p13 }
  0x46   : > { %902 = shalt.err (!%p899_p2)
}
  0x47   : > { %772 = dma.hbm_to_vmem [thread:$0]  (!%p1112_p11), %s1110_s27, 128, %s1116_s22, %s124_s28  }
  0x48   : > { %p1239_p5 = scmp.ne.s32.totalorder %s1234_s17, 0 }
  0x49   : > { %s1146_s20 = sand.u32 (!%p1239_p5), 1, %s965_s10   ;;  %p1240_p0 = scmp.ne.s32.totalorder (!%p1239_p5), %s1232_s15, 0 }
  0x4a   : > { %144 = sbr.rel (%p1239_p5) target bundleno = 489 (0x1e9), region = 28  ;;  %s722_s26 = sshll.u32 (!%p1239_p5), %s1146_s20, 3 }
  0x4b   : > { %s147_s19 = scalar_lea.sflag (!%p1239_p5), [#allocation4], %s1146_s20  ;;  %s150_s29 = scalar_lea.vmem (!%p1239_p5), [#allocation3], %s722_s26 }
  0x51   : > { %948 = dma.done.wait (%p1240_p0), %s147_s19, 128  }
  0x52   : > { %950 = vsyncadd (%p1240_p0), %s147_s19, 4294967168  ;;  %p1241_p1 = scmp.eq.s32.totalorder %s1031_s13, 0 }
  0x54   : > { %952 = dma.done.wait (%p1241_p1), [#allocation7], 128   ;;  %p1242_p11 = pmov %p1241_p1 }
  0x55   : > { %v182_v0 = vlaneseq  ;;  %v979_v1 = vmov 1983009808   ;;  %v208_v6 = vld [vmem:[%s150_s29] sm:$0xff]  ;;  %s980_s17 = smov 110   ;;  %s981_s27 = smov 111   ;;  %v984_v12 = vmov 0.0  }
  0x56   : > { %954 = vsyncadd (%p1242_p11), [#allocation7], 4294967168  ;;  %v180_v2 = vunpack.c.l.s4 %v979_v1  ;;  %v210_v8 = vcombine.low %v208_v6, %v208_v6  ;;  %v178_v9 = vcombine.high %v208_v6, %v208_v6  ;;  %s982_s15 = smov 93   ;;  %s983_s22 = smov 109   ;;  %745 = vmatprep.subr.bf16.mxu1 %v984_v12  ;;  %vm990_vm0 = vmmov 0  }
  0x57   : > { %v183_v3 = vshrl.u32 %v182_v0, 7  ;;  %s985_s23 = smov 92   ;;  %s986_s28 = smov 91   ;;  %751 = vmatprep.mubr.msk.bf16.mxu1 %vm990_vm0, %v984_v12  ;;  %v991_v13 = vmov 0   ;;  %vm232_vm1 = vcmask 900096   ;;  %vm294_vm2 = vcmask 760832  }
  0x58   : > { %v181_v4 = vunpack.c.0.s8 %v180_v2  ;;  %s987_s30 = smov 75   ;;  %s988_s3 = smov 74   ;;  %559 = vmatprep.mubr.bf16.mxu0 %v991_v13  ;;  %vm199_vm3 = vcmask 1043456   ;;  %vm201_vm4 = vcmask 908288   ;;  %vm263_vm5 = vcmask 891904  }
  0x59   : > { %s989_s4 = smov 73   ;;  %vm325_vm6 = vcmask 752640   ;;  %vm356_vm7 = vcmask 744448   ;;  %vm387_vm8 = vcmask 613376   ;;  %vm418_vm9 = vcmask 605184   ;;  %s755_s5 = smul.u32 48, %s1146_s20 }
  0x5a   : > { %v184_v5 = vsub.s32 %v181_v4, %v183_v3  ;;  %vm449_vm10 = vcmask 596992   ;;  %vm517_vm11 = vcmask 1041408   ;;  %vm513_vm12 = vcmask 293888   ;;  %s756_s18 = smul.u32 768, %s1031_s13  ;;  %s618_s26 = scalar_lea.sflag [#allocation5], %s1146_s20 }
  0x5b   : > { %s174_s6 = scalar_lea.vmem [#allocation8], %s755_s5  ;;  %s992_s29 = smov [#allocation8]  }
  0x5c   : > { %v224_v7 = vrot.slane %v208_v6, %v184_v5  ;;  %v217_v10 = vrot.slane %v210_v8, %v184_v5  ;;  %v192_v11 = vrot.slane %v178_v9, %v184_v5  ;;  %s631_s7 = sshll.u32 %s174_s6, 4  ;;  %s1182_s13 = scalar_lea.hbm %s1228_s2, %s756_s18  ;;  %s1177_s7 = int_to_ptr.vmem [resolvable:$true] %s631_s7 }
  0x5d   : > { %s903_s19 = scalar_lea.vmem %s1177_s7, 768 }
  0x5e   : > { %227 = vrot.lane.b32.xlu1 %v224_v7, %s980_s17  ;;  %193 = vrot.lane.b32.xlu0 %v224_v7, %s981_s27  ;;  %p904_p4 = scmp.ne.s32.totalorder %s1177_s7, %s903_s19 }
  0x60   : > { %p905_p6 = pnand %p904_p4, %p1101_p12 }
  0x62   : > { %289 = vrot.lane.b32.xlu1 %v224_v7, %s982_s15  ;;  %256 = vrot.lane.b32.xlu0 %v224_v7, %s983_s22  ;;  %p906_p8 = pneg %p905_p6 }
  0x66   : > { %225 = vrot.lane.b32.xlu1 %v217_v10, %s980_s17  ;;  %195 = vrot.lane.b32.xlu0 %v192_v11, %s981_s27  ;;  %s907_s17 = sshll.u32 %s992_s29, 4  ;;  %s908_s17 = int_to_ptr.vmem [resolvable:$false] %s907_s17 }
  0x67   : > { %s909_s27 = scalar_lea.vmem %s908_s17, 1536  ;;  %p910_p10 = scmp.lt.s32.totalorder %s1177_s7, %s908_s17 }
  0x68   : > { %p911_p13 = scmp.lt.s32.totalorder %s909_s27, %s903_s19 }
  0x6a   : > { %258 = vrot.lane.b32.xlu1 %v192_v11, %s983_s22  ;;  %287 = vrot.lane.b32.xlu0 %v217_v10, %s982_s15  ;;  %p912_p3 = por %p911_p13, %p910_p10 }
  0x6c   : > { %p913_p7 = pnand %p912_p3, %p906_p8 }
  0x6e   : > { %320 = vrot.lane.b32.xlu1 %v192_v11, %s985_s23  ;;  %318 = vrot.lane.b32.xlu0 %v224_v7, %s985_s23 }
  0x72   : > { %351 = vrot.lane.b32.xlu1 %v224_v7, %s986_s28  ;;  %349 = vrot.lane.b32.xlu0 %v217_v10, %s986_s28 }
  0x76   : > { %382 = vrot.lane.b32.xlu1 %v192_v11, %s987_s30  ;;  %380 = vrot.lane.b32.xlu0 %v224_v7, %s987_s30 }
  0x7a   : > { %413 = vrot.lane.b32.xlu1 %v224_v7, %s988_s3  ;;  %411 = vrot.lane.b32.xlu0 %v217_v10, %s988_s3 }
  0x7e   : > { %444 = vrot.lane.b32.xlu1 %v192_v11, %s989_s4  ;;  %442 = vrot.lane.b32.xlu0 %v224_v7, %s989_s4 }
  0xd0   : > { %v228_v14 = vpop.permute.xlu1 %227  ;;  %v194_v15 = vpop.permute.xlu0 %193 }
  0xd1   : > { %v230_v16 = vrot.slane %v228_v14, 4  ;;  %v197_v24 = vrot.slane %v194_v15, 4 }
  0xd3   : > { %v234_v17 = vsel %vm232_vm1, %v228_v14, %v230_v16 }
  0xd4   : > { %238 = vst [vmem:[#allocation2 + $0x8] sm:$0xc] %v234_v17  ;;  %v290_v18 = vpop.permute.xlu1 %289  ;;  %v257_v19 = vpop.permute.xlu0 %256 }
  0xd5   : > { %v292_v20 = vrot.slane %v290_v18, 4  ;;  %v260_v34 = vrot.slane %v257_v19, 4 }
  0xd7   : > { %v296_v21 = vsel %vm294_vm2, %v290_v18, %v292_v20 }
  0xd8   : > { %300 = vst [vmem:[#allocation2 + $0x14] sm:$0xc] %v296_v21  ;;  %v226_v22 = vpop.permute.xlu1 %225  ;;  %v196_v23 = vpop.permute.xlu0 %195 }
  0xd9   : > { %v229_v25 = vrot.slane %v226_v22, 4  ;;  %v198_v26 = vrot.slane %v196_v23, 4 }
  0xdb   : > { %v231_v27 = vsel %vm199_vm3, %v229_v25, %v230_v16  ;;  %v200_v28 = vsel %vm199_vm3, %v197_v24, %v198_v26  ;;  %v203_v29 = vsel %vm201_vm4, %v196_v23, %v198_v26  ;;  %v844_v25 = vld [vmem:[#allocation6] sm:$0xff]  }
  0xdc   : > { %v233_v30 = vsel %vm232_vm1, %v226_v22, %v231_v27  ;;  %v202_v31 = vsel %vm201_vm4, %v194_v15, %v200_v28  ;;  %207 = vst [vmem:[#allocation2 + $0x8] sm:$0x3] %v203_v29  ;;  %v259_v32 = vpop.permute.xlu1 %258  ;;  %v288_v33 = vpop.permute.xlu0 %287 }
  0xdd   : > { %237 = vst [vmem:[#allocation2] sm:$0xcc] %v233_v30  ;;  %206 = vst [vmem:[#allocation2] sm:$0x33] %v202_v31  ;;  %v261_v35 = vrot.slane %v259_v32, 4  ;;  %v291_v36 = vrot.slane %v288_v33, 4 }
  0xdf   : > { %v262_v37 = vsel %vm199_vm3, %v260_v34, %v261_v35  ;;  %v265_v38 = vsel %vm263_vm5, %v259_v32, %v261_v35  ;;  %v293_v39 = vsel %vm199_vm3, %v291_v36, %v292_v20 }
  0xe0   : > { %v264_v40 = vsel %vm263_vm5, %v257_v19, %v262_v37  ;;  %269 = vst [vmem:[#allocation2 + $0x14] sm:$0x3] %v265_v38  ;;  %v295_v41 = vsel %vm294_vm2, %v288_v33, %v293_v39  ;;  %v321_v42 = vpop.permute.xlu1 %320  ;;  %v319_v43 = vpop.permute.xlu0 %318 }
  0xe1   : > { %268 = vst [vmem:[#allocation2 + $0xc] sm:$0x33] %v264_v40  ;;  %299 = vst [vmem:[#allocation2 + $0xc] sm:$0xcc] %v295_v41  ;;  %v323_v44 = vrot.slane %v321_v42, 4  ;;  %v322_v45 = vrot.slane %v319_v43, 4 }
  0xe3   : > { %v327_v46 = vsel %vm325_vm6, %v321_v42, %v323_v44  ;;  %v324_v47 = vsel %vm199_vm3, %v322_v45, %v323_v44 }
  0xe4   : > { %331 = vst [vmem:[#allocation2 + $0x20] sm:$0x3] %v327_v46  ;;  %v326_v48 = vsel %vm325_vm6, %v319_v43, %v324_v47  ;;  %v352_v49 = vpop.permute.xlu1 %351  ;;  %v350_v50 = vpop.permute.xlu0 %349 }
  0xe5   : > { %330 = vst [vmem:[#allocation2 + $0x18] sm:$0x33] %v326_v48  ;;  %v354_v51 = vrot.slane %v352_v49, 4  ;;  %v353_v52 = vrot.slane %v350_v50, 4 }
  0xe7   : > { %v358_v53 = vsel %vm356_vm7, %v352_v49, %v354_v51  ;;  %v355_v54 = vsel %vm199_vm3, %v353_v52, %v354_v51  ;;  %v833_v55 = vld [vmem:[#allocation2 + $0x8] ss:$12 sps:$4 sm:$0xff]  }
  0xe8   : > { %362 = vst [vmem:[#allocation2 + $0x20] sm:$0xc] %v358_v53  ;;  %v357_v56 = vsel %vm356_vm7, %v350_v50, %v355_v54  ;;  %v383_v57 = vpop.permute.xlu1 %382  ;;  %v381_v58 = vpop.permute.xlu0 %380  ;;  %v834_v59 = vld [vmem:[#allocation2 + $0x4] ss:$12 sps:$4 sm:$0xff]   ;;  %v836_v60 = vld [vmem:[#allocation2] ss:$12 sps:$4 sm:$0xff]   ;;  %746 = vmatpush3.bf16.msra.mxu1 %v833_v55 }
  0xe9   : > { %361 = vst [vmem:[#allocation2 + $0x18] sm:$0xcc] %v357_v56  ;;  %v385_v61 = vrot.slane %v383_v57, 4  ;;  %v384_v62 = vrot.slane %v381_v58, 4  ;;  %527 = vmatprep.subr.bf16.mxu0 %v834_v59  ;;  %747 = vmatprep.subr.bf16.mxu1 %v984_v12 }
  0xea   : > { %528 = vmatpush1.bf16.msra.mxu0 %v836_v60 }
  0xeb   : > { %v389_v63 = vsel %vm387_vm8, %v383_v57, %v385_v61  ;;  %v386_v0 = vsel %vm199_vm3, %v384_v62, %v385_v61 }
  0xec   : > { %393 = vst [vmem:[#allocation2 + $0x2c] sm:$0x3] %v389_v63  ;;  %v388_v1 = vsel %vm387_vm8, %v381_v58, %v386_v0  ;;  %v414_v2 = vpop.permute.xlu1 %413  ;;  %v412_v3 = vpop.permute.xlu0 %411 }
  0xed   : > { %392 = vst [vmem:[#allocation2 + $0x24] sm:$0x33] %v388_v1  ;;  %v416_v4 = vrot.slane %v414_v2, 4  ;;  %v415_v5 = vrot.slane %v412_v3, 4 }
  0xef   : > { %v420_v6 = vsel %vm418_vm9, %v414_v2, %v416_v4  ;;  %v417_v7 = vsel %vm199_vm3, %v415_v5, %v416_v4 }
  0xf0   : > { %424 = vst [vmem:[#allocation2 + $0x2c] sm:$0xc] %v420_v6  ;;  %v419_v8 = vsel %vm418_vm9, %v412_v3, %v417_v7  ;;  %v445_v9 = vpop.permute.xlu1 %444  ;;  %v443_v10 = vpop.permute.xlu0 %442 }
  0xf1   : > { %423 = vst [vmem:[#allocation2 + $0x24] sm:$0xcc] %v419_v8  ;;  %v447_v11 = vrot.slane %v445_v9, 4  ;;  %v446_v13 = vrot.slane %v443_v10, 4 }
  0xf3   : > { %v451_v14 = vsel %vm449_vm10, %v445_v9, %v447_v11  ;;  %v448_v15 = vsel %vm199_vm3, %v446_v13, %v447_v11 }
  0xf4   : > { %455 = vst [vmem:[#allocation2 + $0x38] sm:$0x3] %v451_v14  ;;  %v450_v16 = vsel %vm449_vm10, %v443_v10, %v448_v15 }
  0xf5   : > { %454 = vst [vmem:[#allocation2 + $0x30] sm:$0x33] %v450_v16 }
  0xf7   : > { %v837_v17 = vld [vmem:[#allocation2 + $0x20] ss:$12 sps:$4 sm:$0xff]  }
  0xf8   : > { %v838_v18 = vld [vmem:[#allocation2 + $0x1c] ss:$12 sps:$4 sm:$0xff]   ;;  %v840_v19 = vld [vmem:[#allocation2 + $0x18] ss:$12 sps:$4 sm:$0xff]   ;;  %748 = vmatpush3.bf16.msra.mxu1 %v837_v17 }
  0xf9   : > { %529 = vmatprep.subr.bf16.mxu0 %v838_v18  ;;  %749 = vmatprep.subr.bf16.mxu1 %v984_v12 }
  0xfa   : > { %530 = vmatpush1.bf16.msra.mxu0 %v840_v19 }
  0xfb   : > { %v842_v20 = vld [vmem:[#allocation2 + $0x38] ss:$0 sps:$4 sm:$0x33]  }
  0xfc   : > { %v466_v21 = vld [vmem:[#allocation2 + $0x30] sm:$0x33]  ;;  %v525_v23 = vsel %vm517_vm11, %v842_v20, 0 }
  0xfd   : > { %v732_v22 = vcombine.high %v466_v21, %v466_v21  ;;  %v731_v24 = vcombine.low %v466_v21, %v466_v21  ;;  %750 = vmatpush3.bf16.msra.mxu1 %v525_v23 }
  0xff   : > { %734 = vmatprep.subr.msk.bf16.mxu0 %vm517_vm11, %v732_v22  ;;  %v519_v26 = vsel %vm517_vm11, %v731_v24, 0 }
 0x100   : > { %532 = vmatpush1.bf16.msra.mxu0 %v519_v26  ;;  %752 = vmatmul.mubr.msk.bf16.vlgmr.msra.gmra.mrb[0].mxu1 %vm513_vm12, %v844_v25 }
 0x103   : > { %735 = vmatmul.mubr.msk.bf16.vlgmr.msra.gmra.mrb[0].mxu0 %vm513_vm12, %v844_v25 }
 0x1d3   : > { %v604_v12 = vpop.f32.mrb[0].mxu1 }
 0x1d4   : > { %613 = vst [vmem:[%s174_s6 + $0x10] sm:$0xff] %v604_v12  ;;  %v753_v27 = vpop.f32.mrb[1].mxu1 }
 0x1d5   : > { %v607_v29 = vpop.f32.mrb[2].mxu1 }
 0x1d6   : > { %v561_v28 = vpop.f32.mrb[0].mxu0  ;;  %616 = vst [vmem:[%s174_s6 + $0x28] sm:$0xff] %v607_v29  ;;  %v754_v31 = vpop.f32.mrb[3].mxu1 }
 0x1d7   : > { %611 = vst [vmem:[%s174_s6] sm:$0xff] %v561_v28  ;;  %v563_v30 = vpop.f32.mrb[1].mxu0 }
 0x1d8   : > { %612 = vst [vmem:[%s174_s6 + $0x8] sm:$0xff] %v563_v30  ;;  %v565_v32 = vpop.f32.mrb[2].mxu0 }
 0x1d9   : > { %614 = vst [vmem:[%s174_s6 + $0x18] sm:$0xff] %v565_v32  ;;  %v567_v33 = vpop.f32.mrb[3].mxu0 }
 0x1da   : > { %615 = vst [vmem:[%s174_s6 + $0x20] sm:$0xff] %v567_v33 }
 0x1db   : > { %916 = shalt.err (!%p913_p7)
}
 0x1dc   : > { %s917_s15 = scalar_lea.hbm %s1182_s13, 768  ;;  %s921_s28 = scalar_lea.hbm %s1228_s2, 1536 }
 0x1dd   : > { %p918_p9 = scmp.ne.s32.totalorder %s1182_s13, %s917_s15  ;;  %p922_p0 = scmp.lt.u32.totalorder %s1182_s13, %s1228_s2 }
 0x1de   : > { %p923_p1 = scmp.lt.u32.totalorder %s921_s28, %s917_s15  ;;  %p925_p4 = scmp.lt.u32.totalorder %s917_s15, %s1182_s13 }
 0x1df   : > { %p919_p2 = pnand %p918_p9, %p1101_p12 }
 0x1e0   : > { %p924_p11 = por %p923_p1, %p922_p0 }
 0x1e1   : > { %p920_p5 = pneg %p919_p2 }
 0x1e2   : > { %p926_p6 = por %p925_p4, %p924_p11 }
 0x1e4   : > { %p927_p8 = pnand %p926_p6, %p920_p5 }
 0x1e6   : > { %930 = shalt.err (!%p927_p8)
}
 0x1e7   : > { %s993_s4 = smov 384   ;;  %s994_s5 = smov 24  }
 0x1e8   : > { %763 = dma.vmem_to_hbm [thread:$0]  (%p1101_p12), %s1177_s7, 768, %s1182_s13, %s618_s26, %s993_s4, %s993_s4, %s994_s5  }
 0x1e9 PF: > { %s646_s6 = sand.u32 1, %s961_s9   ;;  %p1243_p10 = scmp.ne.s32.totalorder %s1233_s16, 0 }
 0x1ea   : > { %p1244_p13 = scmp.ge.s32.totalorder %s973_s12, 2  ;;  %s647_s18 = scalar_lea.sflag [#allocation5], %s646_s6 }
 0x1ec   : > { %p774_p3 = pnand %p1244_p13, %p1243_p10 }
 0x1ee   : > { %956 = dma.done.wait (!%p774_p3), %s647_s18, 768  }
 0x1ef   : > { %958 = vsyncadd (!%p774_p3), %s647_s18, 4294966528  ;;  %p16_p7 = scmp.ge.s32.totalorder %s1066_s21, 4   ;;  %s1245_s9 = smov %s965_s10 }
 0x1f0   : > { %s1246_s10 = smov %s969_s11  ;;  %s1247_s11 = smov %s1097_s8 }
 0x1f1   : > { %s1248_s12 = smov %s1066_s21  ;;  %18 = sbr.rel (!%p16_p7) target bundleno = 6 (0x6), region = 77 }
 0x1f8   :  { %652 = vsyncpa [#allocation4], 1 }
 0x1f9   :  { %654 = vsyncpa [#allocation4 + $0x1], 1 }
 0x1fa   :  { %655 = vsyncpa [#allocation7], 1 }
 0x1fb   :  { %656 = vsyncpa [#allocation5], 1 }
 0x1fc   :  { %658 = vsyncpa [#allocation5 + $0x1], 1 }

</bundles_post_ra>
